<compile_context>
chip_gen: v5e
topology: v5e:2x2
jax: 0.10.0
libtpu: 0.0.40
codegen_flags: <defaults>
</compile_context>

<pallas_src>
import jax
import jax.numpy as jnp
import numpy as np
from jax.experimental import pallas as pl
from jax.experimental.pallas import tpu as pltpu


def _round_up(x, m):
    return (x + m - 1) // m * m


def _cdiv(a, b):
    return -(-a // b)


# ----------------------------------------------------------------------------- kernel
def embed_kernel(feat_ref, w_ref, out_ref):
    """feat_ref: (rt, F) per-(b,l) features; w_ref: (F, K*E) coefficients."""
    out_ref[...] = jnp.dot(
        feat_ref[...], w_ref[...], preferred_element_type=jnp.float32
    ).astype(out_ref.dtype)


# ----------------------------------------------------------------------- tiling logic
def _vmem_bytes(rt, F, KE):
    lane = lambda n: _round_up(n, 128)
    sub = lambda n: _round_up(max(n, 1), 8)
    out_b = 2 * sub(rt) * lane(KE) * 4     # double-buffered output block
    feat_b = 2 * sub(rt) * lane(F) * 4     # double-buffered feature block
    w_b = 2 * sub(F) * lane(KE) * 4        # coefficient matrix (constant block)
    return out_b + feat_b + w_b


def _choose_tiling(rows, F, KE, target_block_bytes=1 << 20, min_steps=4,
                   vmem_budget=24 << 20):
    """Pick (row_tile, n_steps, padded_rows): balanced tiles, >=2 steps when possible,
    ~1 MiB output per step, footprint under the v7x-safe VMEM budget."""
    row_bytes = KE * 4
    rt_target = max(8, _round_up(_cdiv(target_block_bytes, row_bytes), 8))
    max_steps = max(1, _cdiv(rows, 8))                 # can't go below 8 rows / step
    n_steps = max(min(min_steps, max_steps), _cdiv(rows, rt_target))
    rt = _round_up(_cdiv(rows, n_steps), 8)            # balanced: padding < 8 + slack
    while rt > 8 and _vmem_bytes(rt, F, KE) > vmem_budget:
        rt = _round_up(rt // 2, 8)
    n_steps = _cdiv(rows, rt)
    return rt, n_steps, rt * n_steps


# ---------------------------------------------------------------------------- wrapper
def embed_forward(traj_loc, mat2, vec, traj_len, tables, ex, loc_max, emb_size,
                  out_dtype=jnp.float32):
    """Pallas implementation of Embed.forward. Returns (B, L, loc_max, emb_size)."""
    su, sl, tu, tl = (float(v) for v in ex)
    esl_t, esu_t, etl_t, etu_t = (t.astype(jnp.float32) for t in tables)  # each (2, E)
    B, L = vec.shape
    K, E = int(loc_max), int(emb_size)
    KE = K * E
    F = 4 * K + 4
    n_loc = mat2.shape[0]
    inv_s = 1.0 / (su - sl)
    inv_t = 1.0 / (tu - tl)

    # ---- Coefficient matrix W (host side, tiny): out = feat @ W, lanes = k*E + e. ----
    eyeK = jnp.eye(K, dtype=jnp.float32)

    def space_block(coef_e):            # (E,) -> (K, K*E), one-hot over k
        return (eyeK[:, :, None] * coef_e[None, None, :]).reshape(K, KE)

    def time_block(coef_e):             # (E,) -> (1, K*E), same coef for every k
        return jnp.tile(coef_e[None, :], (1, K))

    W = jnp.concatenate(
        [
            space_block(esl_t[0] * inv_s),   # pairs with (1-m) * (su - ds_k)
            space_block(esl_t[1] * inv_s),   # pairs with   m   * (su - ds_k)
            space_block(esu_t[0] * inv_s),   # pairs with (1-m) * (ds_k - sl)
            space_block(esu_t[1] * inv_s),   # pairs with   m   * (ds_k - sl)
            time_block(etl_t[0] * inv_t),    # pairs with (1-m) * (tu - dt)
            time_block(etl_t[1] * inv_t),    # pairs with   m   * (tu - dt)
            time_block(etu_t[0] * inv_t),    # pairs with (1-m) * (dt - tl)
            time_block(etu_t[1] * inv_t),    # pairs with   m   * (dt - tl)
        ],
        axis=0,
    ).astype(jnp.float32)                    # (4K+4, K*E)

    # ---- Per-(b, l) feature rows (tiny vs. output; no K-fold repeats). ----
    valid = (jnp.arange(L, dtype=jnp.int32)[None, :] < traj_len[:, None])    # (B, L)
    row_idx = jnp.clip(traj_loc.astype(jnp.int32) - 1, 0, n_loc - 1)         # (B, L)
    gathered = jnp.take(mat2.astype(jnp.float32), row_idx.reshape(-1), axis=0)
    delta_s = jnp.where(valid.reshape(-1)[:, None], gathered, 0.0)           # (BL, K)

    m = valid.reshape(-1).astype(jnp.float32)[:, None]                       # (BL, 1)
    mn = 1.0 - m
    dt = vec.astype(jnp.float32).reshape(-1)[:, None]                        # (BL, 1)
    vsu = su - delta_s                                                       # (BL, K)
    vsl = delta_s - sl                                                       # (BL, K)
    vtu = tu - dt                                                            # (BL, 1)
    vtl = dt - tl                                                            # (BL, 1)
    feat = jnp.concatenate(
        [mn * vsu, m * vsu, mn * vsl, m * vsl,
         mn * vtu, m * vtu, mn * vtl, m * vtl],
        axis=1,
    ).astype(jnp.float32)                                                    # (BL, F)

    # ---- Tile the flat (b, l) row axis; balanced tiles, v7x-safe VMEM. ----
    rows = B * L
    rt, n_steps, rows_p = _choose_tiling(rows, F, KE)
    if rows_p != rows:
        feat = jnp.pad(feat, ((0, rows_p - rows), (0, 0)))   # zero rows -> zero output

    grid_spec = pltpu.PrefetchScalarGridSpec(
        num_scalar_prefetch=0,
        grid=(n_steps,),
        in_specs=[
            pl.BlockSpec((rt, F), lambda i: (i, 0)),     # per-row features
            pl.BlockSpec((F, KE), lambda i: (0, 0)),     # constant coefficient matrix
        ],
        out_specs=pl.BlockSpec((rt, KE), lambda i: (i, 0)),  # lane-dense output slab
    )
    vmem_limit = int(min(100 << 20, max(16 << 20, _vmem_bytes(rt, F, KE) + (4 << 20))))

    out = pl.pallas_call(
        embed_kernel,
        out_shape=jax.ShapeDtypeStruct((rows_p, KE), out_dtype),
        grid_spec=grid_spec,
        compiler_params=pltpu.CompilerParams(
            dimension_semantics=("parallel",),           # disjoint tiles -> 2 TCs on v7x
            vmem_limit_bytes=vmem_limit),
    )(feat, W)

    if rows_p != rows:
        out = out[:rows]
    return out.reshape(B, L, K, E)


# -------------------------------------------------------------------------- reference
def embed_reference(traj_loc, mat2, vec, traj_len, tables, ex, loc_max, emb_size):
    """Pure-JAX re-statement of the PyTorch forward, for verification."""
    su, sl, tu, tl = ex
    esl_t, esu_t, etl_t, etu_t = tables
    B, L = vec.shape
    K = loc_max

    delta_t = jnp.broadcast_to(vec[:, :, None], (B, L, K))
    pos = jnp.arange(L)[None, :]
    valid = pos < traj_len[:, None]                                  # (B, L)
    mask = valid.astype(jnp.int32)                                   # 0/1, const over K

    gathered = mat2[jnp.clip(traj_loc - 1, 0, mat2.shape[0] - 1)]    # (B, L, K)
    delta_s = jnp.where(valid[:, :, None], gathered, 0.0)

    def emb(table):
        return table[mask][:, :, None, :]                            # (B, L, 1, E)

    esl, esu, etl, etu = emb(esl_t), emb(esu_t), emb(etl_t), emb(etu_t)
    vsl = (delta_s - sl)[..., None]
    vsu = (su - delta_s)[..., None]
    vtl = (delta_t - tl)[..., None]
    vtu = (tu - delta_t)[..., None]
    space = (esl * vsu + esu * vsl) / (su - sl)
    time = (etl * vtu + etu * vtl) / (tu - tl)
    return space + time


if __name__ == "__main__":
    # Small, module-consistent shapes.
    B, L = 2, 8            # batch, (padded) trajectory length
    loc_max = 16           # number of candidate locations (last dim of mat2)
    emb_size = 32
    n_loc = 20             # rows of mat2

    # Interval bounds ex = (su, sl, tu, tl).
    ex = (12.0, 0.5, 96.0, 1.0)

    key = jax.random.PRNGKey(0)
    k_mat, k_vec, k_loc, k_sl, k_su, k_tl, k_tu = jax.random.split(key, 7)

    mat2 = jax.random.uniform(k_mat, (n_loc, loc_max), jnp.float32, 0.5, 12.0)
    vec = jax.random.uniform(k_vec, (B, L), jnp.float32, 1.0, 96.0)
    traj_loc = jax.random.randint(k_loc, (B, L), 1, n_loc + 1, jnp.int32)   # 1-indexed
    traj_len = jnp.array([5, 8], dtype=jnp.int32)

    # Deterministic embedding tables (only indices 0/1 of the PyTorch Embedding used).
    tables = (
        jax.random.normal(k_sl, (2, emb_size), jnp.float32),
        jax.random.normal(k_su, (2, emb_size), jnp.float32),
        jax.random.normal(k_tl, (2, emb_size), jnp.float32),
        jax.random.normal(k_tu, (2, emb_size), jnp.float32),
    )

    out = embed_forward(traj_loc, mat2, vec, traj_len, tables, ex, loc_max, emb_size)
    out = jax.block_until_ready(out)

    ref = embed_reference(traj_loc, mat2, vec, traj_len, tables, ex, loc_max, emb_size)
    np.testing.assert_allclose(np.asarray(out), np.asarray(ref), rtol=1e-4, atol=1e-4)

    print("KERNEL_OK")
</pallas_src>

<mosaic_0001>
module attributes {stable_mosaic.version = 11 : i64} {
  func.func @embed_kernel(%arg0: i32, %arg1: memref<8x68xf32, #tpu.memory_space<vmem>>, %arg2: memref<68x512xf32, #tpu.memory_space<vmem>>, %arg3: memref<8x512xf32, #tpu.memory_space<vmem>>) attributes {dimension_semantics = [#tpu.dimension_semantics<parallel>], iteration_bounds = array<i64: 2>, scalar_prefetch = 0 : i64, scratch_operands = 0 : i64, tpu.core_type = #tpu.core_type<tc>, window_params = [{transform_indices = @transform_0, window_bounds = array<i64: 8, 68>}, {pipeline_mode = #tpu.pipeline_mode<synchronous>, transform_indices = @transform_1, window_bounds = array<i64: 68, 512>}, {transform_indices = @transform_2, window_bounds = array<i64: 8, 512>}]} {
    %c0 = arith.constant 0 : index
    %c0_0 = arith.constant 0 : index
    %0 = vector.load %arg1[%c0, %c0_0] : memref<8x68xf32, #tpu.memory_space<vmem>>, vector<8x68xf32>
    %c0_1 = arith.constant 0 : index
    %c0_2 = arith.constant 0 : index
    %1 = vector.load %arg2[%c0_1, %c0_2] : memref<68x512xf32, #tpu.memory_space<vmem>>, vector<68x512xf32>
    %cst = arith.constant dense<0.000000e+00> : vector<8x512xf32>
    %2 = tpu.matmul %0, %1, %cst {dimension_numbers = #tpu.dot_dimension_numbers<[1], [0], [0], [1], [0, 0, 1, 1], [], []>} : vector<8x68xf32>, vector<68x512xf32>, vector<8x512xf32> -> vector<8x512xf32>
    %c0_3 = arith.constant 0 : index
    %c0_4 = arith.constant 0 : index
    %3 = vector.load %arg3[%c0_3, %c0_4] : memref<8x512xf32, #tpu.memory_space<vmem>>, vector<8x512xf32>
    tpu.vector_store %arg3[%c0_3, %c0_4], %2 {strides = array<i32>} : memref<8x512xf32, #tpu.memory_space<vmem>>, vector<8x512xf32>,
    return
  }
  func.func @transform_0(%arg0: i32) -> (i32, i32) {
    %c0_i32 = arith.constant 0 : i32
    %c0_i32_0 = arith.constant 0 : i32
    return %arg0, %c0_i32 : i32, i32
  }
  func.func @transform_1(%arg0: i32) -> (i32, i32) {
    %c0_i32 = arith.constant 0 : i32
    %c0_i32_0 = arith.constant 0 : i32
    %c0_i32_1 = arith.constant 0 : i32
    return %c0_i32, %c0_i32_0 : i32, i32
  }
  func.func @transform_2(%arg0: i32) -> (i32, i32) {
    %c0_i32 = arith.constant 0 : i32
    %c0_i32_0 = arith.constant 0 : i32
    return %arg0, %c0_i32 : i32, i32
  }
}

</mosaic_0001>

<bundles_post_ra>
// kernel: tpu_custom_call.1
= control target key start
LH: loop header
LB: loop body
LE: loop exit
PB: predicated region body
PF: predicated region fallthrough
CT: control target
= control target key end

     0   :  { %7 = vsyncpa [#allocation3], 0  ;;  %s794_s0 = inlined_call_operand.hbm [shape: f32[16,68], index: 0, kind: input, shape index: {}]   ;;  %s795_s1 = inlined_call_operand.hbm [shape: f32[68,512], index: 1, kind: input, shape index: {}]   ;;  %s796_s2 = inlined_call_operand.hbm [shape: f32[16,512], index: 2, kind: output, shape index: {}]  }
   0x1   :  { %9 = vsyncpa [#allocation3 + $0x1], 0 }
   0x2   :  { %10 = vsyncpa [#allocation6], 0 }
   0x3   :  { %11 = vsyncpa [#allocation4], 0 }
   0x4   :  { %13 = vsyncpa [#allocation4 + $0x1], 0  ;;  %s646_s9 = smov 0   ;;  %s648_s10 = smov 0  }
   0x5   :  { %s650_s11 = smov 0   ;;  %s652_s12 = smov 0  }
   0x6 LB: > { %s108_s15 = sshll.u32 %s795_s1, 4  ;;  %s670_s16 = sadd.s32 4294967295, %s626_s12   ;;  %s626_s12 = sphi %s652_s12, %s806_s12   ;;  %s622_s11 = sphi %s650_s11, %s805_s11   ;;  %s618_s10 = sphi %s648_s10, %s804_s10   ;;  %s614_s9 = sphi %s646_s9, %s803_s9   ;;  %s109_s15 = int_to_ptr.hbm [resolvable:$true] %s108_s15 }
   0x7   : > { %p414_p0 = scmp.ge.s32.totalorder %s626_s12, 1  ;;  %p40_p1 = scmp.eq.s32.totalorder %s670_s16, 0 }
   0x8   : > { %p97_p2 = scmp.lt.s32.totalorder %s626_s12, 3  ;;  %s628_s18 = smov [#allocation5]  }
   0x9   : > { %s110_s19 = sshll.u32 %s628_s18, 4  ;;  %s629_s20 = smov 512   ;;  %s111_s19 = int_to_ptr.vmem [resolvable:$true] %s110_s19 }
   0xa   : > { %p675_p3 = pnand %p414_p0, %p97_p2  ;;  %s630_s21 = smov 32  }
   0xb   : > { %s413_s22 = sadd.s32 4294967294, %s626_s12   ;;  %s686_s23 = sadd.s32 1, %s626_s12  }
   0xc   : > { %p445_p4 = pneg %p675_p3  ;;  %s26_s24 = sadd.s32 1, %s622_s11 }
   0xd   : > { %s23_s25 = ssub.s32 %s626_s12, %s686_s23  ;;  %p33_p7 = scmp.ne.s32.totalorder %s622_s11, %s618_s10 }
   0xe   : > { %p446_p6 = pnand %p445_p4, %p40_p1  ;;  %p24_p8 = scmp.eq.s32.totalorder %s23_s25, 0 }
   0xf   : > { %p34_p9 = scmp.eq.s32.totalorder %s626_s12, 0  ;;  %p39_p10 = scmp.ne.s32.totalorder %s618_s10, %s614_s9 }
  0x10   : > { %448 = dma.hbm_to_vmem [thread:$0]  (!%p446_p6), %s109_s15, 4608, %s111_s19, [#allocation6], %s629_s20, %s629_s20, %s630_s21  }
  0x11   : > { %p84_p11 = scmp.eq.s32.totalorder %s670_s16, 1  ;;  %p702_p12 = por %p40_p1, %p39_p10 }
  0x12   : > { %s698_s26 = scalar_select %p24_p8, %s622_s11, %s26_s24  }
  0x13   : > { %p706_p13 = por %p84_p11, %p33_p7  ;;  %p90_p0 = scmp.eq.s32.totalorder %s413_s22, 1 }
  0x14   : > { %p35_p2 = por %p34_p9, %p33_p7  ;;  %s124_s29 = sand.u32 1, %s622_s11  }
  0x15   : > { %p711_p4 = por %p90_p0, %p39_p10  ;;  %p458_p6 = scmp.lt.s32.totalorder %s626_s12, 2 }
  0x16   : > { %s417_s3 = sshll.u32 %s124_s29, 3  ;;  %s418_s4 = sshll.u32 %s626_s12, 3 }
  0x17   : > { %s132_s7 = scalar_lea.hbm %s794_s0, %s418_s4  ;;  %s128_s13 = scalar_lea.vmem [#allocation2], %s417_s3 }
  0x18   : > { %s134_s8 = sshll.u32 %s132_s7, 4  ;;  %s136_s14 = sshll.u32 %s128_s13, 4  ;;  %s135_s8 = int_to_ptr.hbm [resolvable:$true] %s134_s8  ;;  %s137_s14 = int_to_ptr.vmem [resolvable:$true] %s136_s14 }
  0x19   : > { %p720_p8 = pnand %p458_p6, %p35_p2  ;;  %s125_s18 = scalar_lea.sflag [#allocation3], %s124_s29 }
  0x1a   : > { %s526_s19 = sshra.s32 %s135_s8, 4  ;;  %s533_s24 = scalar_lea.hbm %s794_s0, 16  ;;  %s527_s19 = int_to_ptr.hbm [resolvable:$true] %s526_s19 }
  0x1b   : > { %s528_s20 = scalar_lea.hbm %s527_s19, 8  ;;  %p530_p9 = pneg %p720_p8 }
  0x1c   : > { %p529_p7 = scmp.ne.s32.totalorder %s527_s19, %s528_s20  ;;  %p534_p0 = scmp.lt.s32.totalorder %s527_s19, %s794_s0 }
  0x1d   : > { %p535_p2 = scmp.lt.s32.totalorder %s533_s24, %s528_s20 }
  0x1e   : > { %p531_p10 = pnand %p530_p9, %p529_p7 }
  0x1f   : > { %p536_p6 = por %p535_p2, %p534_p0 }
  0x20   : > { %p532_p11 = pneg %p531_p10 }
  0x22   : > { %p537_p5 = pnand %p536_p6, %p532_p11 }
  0x24   : > { %540 = shalt.err (!%p537_p5)
}
  0x25   : > { %452 = dma.hbm_to_vmem [thread:$0]  (!%p720_p8), %s135_s8, 128, %s137_s14, %s125_s18  }
  0x26   : > { %145 = sbr.rel (%p675_p3) target bundleno = 200 (0xc8), region = 28  ;;  %s737_s29 = sand.u32 (!%p675_p3), 1, %s618_s10  }
  0x27   : > { %s420_s4 = sshll.u32 (!%p675_p3), %s737_s29, 3  ;;  %s148_s5 = scalar_lea.sflag (!%p675_p3), [#allocation3], %s737_s29 }
  0x28   : > { %s741_s6 = scalar_lea.vmem (!%p675_p3), [#allocation2], %s420_s4 }
  0x2b   : > { %601 = dma.done.wait (%p702_p12), %s148_s5, 128  }
  0x2c   : > { %603 = vsyncadd (%p702_p12), %s148_s5, 4294967168 }
  0x2d   : > { %605 = dma.done.wait (%p40_p1), [#allocation6], 4608  }
  0x2e   : > { %607 = vsyncadd (%p40_p1), [#allocation6], 4294962688  ;;  %vm219_vm0 = vcmask 1043456   ;;  %v213_v0 = vld [vmem:[#allocation5 + $0x110] sm:$0xf]  ;;  %v210_v3 = vld [vmem:[#allocation5 + $0xf8] sm:$0xff] }
  0x2f   : > { %v214_v1 = vld [vmem:[#allocation5 + $0x118] sm:$0xf]  ;;  %v209_v2 = vld [vmem:[#allocation5 + $0xf0] sm:$0xff]  ;;  %427 = vmatpush.msk.msra.mxu2 %vm219_vm0, %v213_v0  ;;  %v211_v6 = vld [vmem:[#allocation5 + $0x100] sm:$0xf]  ;;  %vm215_vm1 = vcmask 556032  }
  0x30   : > { %429 = vmatpush.msk.msra.mxu3 %vm219_vm0, %v214_v1  ;;  %v205_v4 = vld [vmem:[#allocation5 + $0xd0] sm:$0xff]  ;;  %v206_v5 = vld [vmem:[#allocation5 + $0xd8] sm:$0xff]  ;;  %v212_v7 = vld [vmem:[#allocation5 + $0x108] sm:$0xf]  ;;  %423 = vmatpush.msk.msra.mxu0 %vm219_vm0, %v211_v6  ;;  %s422_s17 = sshll.u32 %s737_s29, 5  ;;  %s436_s27 = sshll.u32 %s670_s16, 5 }
  0x31   : > { %280 = vmatpush.msra.mxu2 %v209_v2  ;;  %v207_v8 = vld [vmem:[#allocation5 + $0xe0] sm:$0xff]  ;;  %v208_v9 = vld [vmem:[#allocation5 + $0xe8] sm:$0xff]  ;;  %425 = vmatpush.msk.msra.mxu1 %vm219_vm0, %v212_v7  ;;  %v201_v10 = vld [vmem:[#allocation5 + $0xb0] sm:$0xff]  ;;  %s328_s13 = scalar_lea.hbm %s796_s2, %s436_s27  ;;  %s177_s14 = scalar_lea.vmem [#allocation7], %s422_s17 }
  0x32   : > { %300 = vmatpush.msra.mxu3 %v210_v3  ;;  %v202_v11 = vld [vmem:[#allocation5 + $0xb8] sm:$0xff]  ;;  %v203_v12 = vld [vmem:[#allocation5 + $0xc0] sm:$0xff]  ;;  %v204_v13 = vld [vmem:[#allocation5 + $0xc8] sm:$0xff]  ;;  %240 = vmatpush.msra.mxu0 %v207_v8  ;;  %s330_s15 = sshll.u32 %s177_s14, 4  ;;  %s332_s18 = sshll.u32 %s328_s13, 4  ;;  %s331_s15 = int_to_ptr.vmem [resolvable:$true] %s330_s15  ;;  %s333_s18 = int_to_ptr.hbm [resolvable:$true] %s332_s18 }
  0x33   : > { %281 = vmatpush.msra.mxu2 %v205_v4  ;;  %260 = vmatpush.msra.mxu1 %v208_v9  ;;  %v197_v14 = vld [vmem:[#allocation5 + $0x90] sm:$0xff]  ;;  %v198_v15 = vld [vmem:[#allocation5 + $0x98] sm:$0xff]  ;;  %v199_v16 = vld [vmem:[#allocation5 + $0xa0] sm:$0xff]  ;;  %s317_s19 = scalar_lea.sflag [#allocation4], %s737_s29  ;;  %s570_s16 = sshra.s32 %s333_s18, 4  ;;  %s571_s16 = int_to_ptr.hbm [resolvable:$true] %s570_s16 }
  0x34   : > { %301 = vmatpush.msra.mxu3 %v206_v5  ;;  %v200_v17 = vld [vmem:[#allocation5 + $0xa8] sm:$0xff]  ;;  %241 = vmatpush.msra.mxu0 %v203_v12  ;;  %v193_v18 = vld [vmem:[#allocation5 + $0x70] sm:$0xff]  ;;  %v194_v19 = vld [vmem:[#allocation5 + $0x78] sm:$0xff]  ;;  %s572_s20 = scalar_lea.hbm %s571_s16, 32  ;;  %s576_s24 = scalar_lea.hbm %s796_s2, 64 }
  0x35   : > { %282 = vmatpush.msra.mxu2 %v201_v10  ;;  %261 = vmatpush.msra.mxu1 %v204_v13  ;;  %v195_v20 = vld [vmem:[#allocation5 + $0x80] sm:$0xff]  ;;  %v196_v21 = vld [vmem:[#allocation5 + $0x88] sm:$0xff]  ;;  %v189_v22 = vld [vmem:[#allocation5 + $0x50] sm:$0xff]  ;;  %p573_p1 = scmp.ne.s32.totalorder %s571_s16, %s572_s20  ;;  %p577_p12 = scmp.lt.s32.totalorder %s571_s16, %s796_s2 }
  0x36   : > { %302 = vmatpush.msra.mxu3 %v202_v11  ;;  %242 = vmatpush.msra.mxu0 %v199_v16  ;;  %v190_v23 = vld [vmem:[#allocation5 + $0x58] sm:$0xff]  ;;  %v191_v24 = vld [vmem:[#allocation5 + $0x60] sm:$0xff]  ;;  %v192_v25 = vld [vmem:[#allocation5 + $0x68] sm:$0xff]  ;;  %p578_p8 = scmp.lt.s32.totalorder %s576_s24, %s572_s20 }
  0x37   : > { %283 = vmatpush.msra.mxu2 %v197_v14  ;;  %262 = vmatpush.msra.mxu1 %v200_v17  ;;  %v185_v26 = vld [vmem:[#allocation5 + $0x30] sm:$0xff]  ;;  %v186_v27 = vld [vmem:[#allocation5 + $0x38] sm:$0xff]  ;;  %v187_v28 = vld [vmem:[#allocation5 + $0x40] sm:$0xff]  ;;  %p574_p3 = pnand %p573_p1, %p706_p13 }
  0x38   : > { %303 = vmatpush.msra.mxu3 %v198_v15  ;;  %243 = vmatpush.msra.mxu0 %v195_v20  ;;  %v188_v29 = vld [vmem:[#allocation5 + $0x48] sm:$0xff]  ;;  %v181_v30 = vld [vmem:[#allocation5 + $0x10] sm:$0xff]  ;;  %v182_v31 = vld [vmem:[#allocation5 + $0x18] sm:$0xff]  ;;  %p579_p7 = por %p578_p8, %p577_p12 }
  0x39   : > { %284 = vmatpush.msra.mxu2 %v193_v18  ;;  %263 = vmatpush.msra.mxu1 %v196_v21  ;;  %v178_v32 = vld [vmem:[%s741_s6] sm:$0xff]  ;;  %v183_v33 = vld [vmem:[#allocation5 + $0x20] sm:$0xff]  ;;  %v184_v34 = vld [vmem:[#allocation5 + $0x28] sm:$0xff]  ;;  %p575_p5 = pneg %p574_p3 }
  0x3a   : > { %304 = vmatpush.msra.mxu3 %v194_v19  ;;  %244 = vmatpush.msra.mxu0 %v191_v24  ;;  %v179_v35 = vld [vmem:[#allocation5] sm:$0xff]  ;;  %v180_v36 = vld [vmem:[#allocation5 + $0x8] sm:$0xff] }
  0x3b   : > { %285 = vmatpush.msra.mxu2 %v189_v22  ;;  %264 = vmatpush.msra.mxu1 %v192_v25  ;;  %p580_p9 = pnand %p579_p7, %p575_p5 }
  0x3c   : > { %305 = vmatpush.msra.mxu3 %v190_v23  ;;  %245 = vmatpush.msra.mxu0 %v187_v28 }
  0x3d   : > { %286 = vmatpush.msra.mxu2 %v185_v26  ;;  %265 = vmatpush.msra.mxu1 %v188_v29 }
  0x3e   : > { %306 = vmatpush.msra.mxu3 %v186_v27  ;;  %246 = vmatpush.msra.mxu0 %v183_v33 }
  0x3f   : > { %287 = vmatpush.msra.mxu2 %v181_v30  ;;  %266 = vmatpush.msra.mxu1 %v184_v34 }
  0x40   : > { %307 = vmatpush.msra.mxu3 %v182_v31  ;;  %428 = vmatmul.msk.f32.vlgmr.msra.gmra.mxu2 %vm215_vm1, %v178_v32 }
  0x41   : > { %430 = vmatmul.msk.f32.vlgmr.msra.gmra.mxu3 %vm215_vm1, %v178_v32  ;;  %247 = vmatpush.msra.mxu0 %v179_v35 }
  0x42   : > { %267 = vmatpush.msra.mxu1 %v180_v36  ;;  %424 = vmatmul.msk.f32.vlgmr.msra.gmra.mxu0 %vm215_vm1, %v178_v32 }
  0x43   : > { %426 = vmatmul.msk.f32.vlgmr.msra.gmra.mxu1 %vm215_vm1, %v178_v32 }
  0xbf   : > { %v249_v37 = vpop.f32.mrf.mxu0 }
  0xc0   : > { %v269_v38 = vpop.f32.mrf.mxu1  ;;  %312 = vst [vmem:[%s177_s14] sm:$0xff] %v249_v37 }
  0xc1   : > { %313 = vst [vmem:[%s177_s14 + $0x8] sm:$0xff] %v269_v38 }
  0xc3   : > { %v289_v39 = vpop.f32.mrf.mxu2 }
  0xc4   : > { %v309_v40 = vpop.f32.mrf.mxu3  ;;  %314 = vst [vmem:[%s177_s14 + $0x10] sm:$0xff] %v289_v39 }
  0xc5   : > { %315 = vst [vmem:[%s177_s14 + $0x18] sm:$0xff] %v309_v40 }
  0xc6   : > { %583 = shalt.err (!%p580_p9)
}
  0xc7   : > { %443 = dma.vmem_to_hbm [thread:$0]  (%p706_p13), %s331_s15, 512, %s333_s18, %s317_s19  }
  0xc8 PF: > { %s344_s29 = sand.u32 1, %s614_s9   ;;  %p802_p10 = scmp.ge.s32.totalorder %s626_s12, 2 }
  0xc9   : > { %s345_s4 = scalar_lea.sflag [#allocation4], %s344_s29 }
  0xca   : > { %p454_p11 = pnand %p802_p10, %p711_p4 }
  0xcc   : > { %p455_p0 = pneg %p454_p11 }
  0xce   : > { %609 = dma.done.wait (%p455_p0), %s345_s4, 512  }
  0xcf   : > { %611 = vsyncadd (%p455_p0), %s345_s4, 4294966784  ;;  %p16_p2 = scmp.ge.s32.totalorder %s686_s23, 4   ;;  %s803_s9 = smov %s618_s10 }
  0xd0   : > { %s804_s10 = smov %s622_s11  ;;  %s805_s11 = smov %s698_s26 }
  0xd1   : > { %s806_s12 = smov %s686_s23  ;;  %18 = sbr.rel (!%p16_p2) target bundleno = 6 (0x6), region = 77 }
  0xd6   :  { %351 = vsyncpa [#allocation3], 1 }
  0xd7   :  { %353 = vsyncpa [#allocation3 + $0x1], 1 }
  0xd8   :  { %354 = vsyncpa [#allocation6], 1 }
  0xd9   :  { %355 = vsyncpa [#allocation4], 1 }
  0xda   :  { %357 = vsyncpa [#allocation4 + $0x1], 1 }

</bundles_post_ra>
